<compile_context>
chip_gen: v7x
topology: tpu7x:2x2x1
jax: 0.10.0
libtpu: 0.0.40
codegen_flags: <defaults>
</compile_context>

<pallas_src>
import functools
import math

import jax
import jax.numpy as jnp
from jax.experimental import pallas as pl
from jax.experimental.pallas import tpu as pltpu

INPUT_NODES = 42
HIDDEN_NODES = 60
OUTPUT_NODES = 1
BN_EPS = 1e-5
DROPOUT_P = 0.5
LANE = 128


def _round_up(v, m):
    return ((v + m - 1) // m) * m


# ---------------------------------------------------------------------------
# Pass 1: per-feature sum / sum-of-squares of fc1(x) over the whole batch.
# Layout: x_ref (42, TILE_N), w1_ref (60, 42), b1_ref (60, 1).
# Outputs are (60, 1) accumulators kept resident across the (sequential) grid.
# ---------------------------------------------------------------------------
def bn_stats_kernel(x_ref, w1_ref, b1_ref, sum_ref, sumsq_ref, *, n_valid, tile_n):
    i = pl.program_id(0)

    h1 = jnp.dot(w1_ref[...], x_ref[...],
                 preferred_element_type=jnp.float32) + b1_ref[...]          # (60, TILE_N)

    # Mask out padded batch columns so they do not contribute to the stats.
    lane = jax.lax.broadcasted_iota(jnp.int32, (1, tile_n), 1) + i * tile_n
    h1 = jnp.where(lane < n_valid, h1, 0.0)

    # Reduce over lanes on the (otherwise idle) MXU via a ones column.
    ones = jnp.ones((tile_n, 1), jnp.float32)
    s = jnp.dot(h1, ones, preferred_element_type=jnp.float32)               # (60, 1)
    ss = jnp.dot(h1 * h1, ones, preferred_element_type=jnp.float32)         # (60, 1)

    @pl.when(i == 0)
    def _():
        sum_ref[...] = jnp.zeros_like(sum_ref)
        sumsq_ref[...] = jnp.zeros_like(sumsq_ref)

    sum_ref[...] += s
    sumsq_ref[...] += ss


# ---------------------------------------------------------------------------
# Pass 2: full forward for one batch tile (batch on the lane axis).
# BN affine is pre-folded into scale/shift (2 elementwise ops per element).
# drop_ref already contains 0.0 / (1/(1-p)) multipliers.
# ---------------------------------------------------------------------------
def fwd_kernel(x_ref, w1_ref, b1_ref, scale_ref, shift_ref,
               w2_ref, b2_ref, drop_ref, w3_ref, b3_ref, out_ref):
    h1 = jnp.dot(w1_ref[...], x_ref[...],
                 preferred_element_type=jnp.float32) + b1_ref[...]          # (60, TILE_N)
    h1 = jnp.tanh(h1 * scale_ref[...] + shift_ref[...])

    h2 = jnp.dot(w2_ref[...], h1,
                 preferred_element_type=jnp.float32) + b2_ref[...]          # (60, TILE_N)
    h2 = jnp.tanh(h2 * drop_ref[...])

    out = jnp.dot(w3_ref[...], h2,
                  preferred_element_type=jnp.float32) + b3_ref[...]         # (1, TILE_N)
    out_ref[...] = out.astype(out_ref.dtype)


def mlp_forward(x, params, dropout_key, *, tile_n=512):
    """x: (N, 42) float32. Returns (N, 1) float32 (training-mode forward)."""
    n = x.shape[0]
    w1, b1, g1, be1, w2, b2, w3, b3 = params

    # Tile size: multiple of 128 lanes, no bigger than the (padded) batch.
    tile_n = max(LANE, min(_round_up(tile_n, LANE), _round_up(n, LANE)))
    n_pad = _round_up(n, tile_n)
    grid = (n_pad // tile_n,)

    # Transposed, batch-padded input: (42, n_pad), batch on lanes.
    x_pad = jnp.zeros((n_pad, INPUT_NODES), jnp.float32).at[:n].set(
        x.astype(jnp.float32))
    xt = x_pad.T

    const = lambda i: (0, 0)
    batch = lambda i: (0, i)

    # ---- pass 1: batch statistics of fc1(x) ----
    sums, sumsqs = pl.pallas_call(
        functools.partial(bn_stats_kernel, n_valid=n, tile_n=tile_n),
        out_shape=(jax.ShapeDtypeStruct((HIDDEN_NODES, 1), jnp.float32),
                   jax.ShapeDtypeStruct((HIDDEN_NODES, 1), jnp.float32)),
        grid=grid,
        in_specs=[pl.BlockSpec((INPUT_NODES, tile_n), batch),
                  pl.BlockSpec((HIDDEN_NODES, INPUT_NODES), const),
                  pl.BlockSpec((HIDDEN_NODES, 1), const)],
        out_specs=(pl.BlockSpec((HIDDEN_NODES, 1), const),
                   pl.BlockSpec((HIDDEN_NODES, 1), const)),
        compiler_params=pltpu.CompilerParams(
            dimension_semantics=("arbitrary",)),
    )(xt, w1, b1)

    # ---- fold BN (training, biased variance) into per-feature scale/shift ----
    inv_n = 1.0 / float(n)
    mean = sums * inv_n
    var = jnp.maximum(sumsqs * inv_n - mean * mean, 0.0)
    scale = g1 * jax.lax.rsqrt(var + BN_EPS)       # (60, 1)
    shift = be1 - mean * scale                     # (60, 1)

    # ---- host-side dropout multipliers (0 or 1/(1-p)), transposed layout ----
    keep = jax.random.bernoulli(dropout_key, 1.0 - DROPOUT_P,
                                (HIDDEN_NODES, n_pad))
    drop = keep.astype(jnp.float32) * (1.0 / (1.0 - DROPOUT_P))

    flops = 2 * n_pad * (INPUT_NODES * HIDDEN_NODES
                         + HIDDEN_NODES * HIDDEN_NODES
                         + HIDDEN_NODES * OUTPUT_NODES)
    bytes_accessed = 4 * (n_pad * (INPUT_NODES + 2 * HIDDEN_NODES + OUTPUT_NODES)
                          + INPUT_NODES * HIDDEN_NODES
                          + HIDDEN_NODES * HIDDEN_NODES
                          + HIDDEN_NODES * OUTPUT_NODES)

    # ---- pass 2: tiled forward, lane-dense (1, n_pad) output ----
    out_t = pl.pallas_call(
        fwd_kernel,
        out_shape=jax.ShapeDtypeStruct((OUTPUT_NODES, n_pad), jnp.float32),
        grid=grid,
        in_specs=[pl.BlockSpec((INPUT_NODES, tile_n), batch),
                  pl.BlockSpec((HIDDEN_NODES, INPUT_NODES), const),
                  pl.BlockSpec((HIDDEN_NODES, 1), const),
                  pl.BlockSpec((HIDDEN_NODES, 1), const),
                  pl.BlockSpec((HIDDEN_NODES, 1), const),
                  pl.BlockSpec((HIDDEN_NODES, HIDDEN_NODES), const),
                  pl.BlockSpec((HIDDEN_NODES, 1), const),
                  pl.BlockSpec((HIDDEN_NODES, tile_n), batch),
                  pl.BlockSpec((OUTPUT_NODES, HIDDEN_NODES), const),
                  pl.BlockSpec((OUTPUT_NODES, 1), const)],
        out_specs=pl.BlockSpec((OUTPUT_NODES, tile_n), batch),
        compiler_params=pltpu.CompilerParams(
            dimension_semantics=("parallel",)),
        cost_estimate=pl.CostEstimate(
            flops=flops,
            transcendentals=2 * n_pad * HIDDEN_NODES,
            bytes_accessed=bytes_accessed),
    )(xt, w1, b1, scale, shift, w2, b2, drop, w3, b3)

    return out_t[:, :n].T                          # (N, 1)


# ---------------------------------------------------------------------------
# Parameter init matching the PyTorch module (weights stored (out, in)).
# ---------------------------------------------------------------------------
def xavier_uniform(key, fan_out, fan_in):
    bound = math.sqrt(6.0 / (fan_in + fan_out))
    return jax.random.uniform(key, (fan_out, fan_in), jnp.float32, -bound, bound)


def linear_bias(key, fan_in, fan_out):
    bound = 1.0 / math.sqrt(fan_in)
    return jax.random.uniform(key, (fan_out, 1), jnp.float32, -bound, bound)


def init_params(key):
    ks = jax.random.split(key, 6)
    w1 = xavier_uniform(ks[0], HIDDEN_NODES, INPUT_NODES)
    b1 = linear_bias(ks[1], INPUT_NODES, HIDDEN_NODES)
    g1 = jnp.ones((HIDDEN_NODES, 1), jnp.float32)      # bn1 weight
    be1 = jnp.zeros((HIDDEN_NODES, 1), jnp.float32)    # bn1 bias
    w2 = xavier_uniform(ks[2], HIDDEN_NODES, HIDDEN_NODES)
    b2 = linear_bias(ks[3], HIDDEN_NODES, HIDDEN_NODES)
    w3 = xavier_uniform(ks[4], OUTPUT_NODES, HIDDEN_NODES)
    b3 = linear_bias(ks[5], HIDDEN_NODES, OUTPUT_NODES)
    return (w1, b1, g1, be1, w2, b2, w3, b3)


if __name__ == "__main__":
    key = jax.random.PRNGKey(0)
    pkey, xkey, dkey = jax.random.split(key, 3)
    params = init_params(pkey)

    batch = 8
    x = jax.random.normal(xkey, (batch, INPUT_NODES), jnp.float32)

    out = mlp_forward(x, params, dkey)
    jax.block_until_ready(out)
    assert out.shape == (batch, OUTPUT_NODES)
    assert bool(jnp.all(jnp.isfinite(out)))
    print("KERNEL_OK")
</pallas_src>

<mosaic_0001>
module attributes {stable_mosaic.version = 11 : i64} {
  func.func @bn_stats_kernel(%arg0: i32, %arg1: memref<42x128xf32, #tpu.memory_space<vmem>>, %arg2: memref<60x42xf32, #tpu.memory_space<vmem>>, %arg3: memref<60x1xf32, #tpu.memory_space<vmem>>, %arg4: memref<60x1xf32, #tpu.memory_space<vmem>>, %arg5: memref<60x1xf32, #tpu.memory_space<vmem>>) attributes {dimension_semantics = [#tpu.dimension_semantics<arbitrary>], iteration_bounds = array<i64: 1>, scalar_prefetch = 0 : i64, scratch_operands = 0 : i64, tpu.core_type = #tpu.core_type<tc>, window_params = [{transform_indices = @transform_0, window_bounds = array<i64: 42, 128>}, {pipeline_mode = #tpu.pipeline_mode<synchronous>, transform_indices = @transform_1, window_bounds = array<i64: 60, 42>}, {pipeline_mode = #tpu.pipeline_mode<synchronous>, transform_indices = @transform_2, window_bounds = array<i64: 60, 1>}, {pipeline_mode = #tpu.pipeline_mode<synchronous>, transform_indices = @transform_3, window_bounds = array<i64: 60, 1>}, {pipeline_mode = #tpu.pipeline_mode<synchronous>, transform_indices = @transform_4, window_bounds = array<i64: 60, 1>}]} {
    %c0 = arith.constant 0 : index
    %c0_0 = arith.constant 0 : index
    %0 = vector.load %arg2[%c0, %c0_0] : memref<60x42xf32, #tpu.memory_space<vmem>>, vector<60x42xf32>
    %c0_1 = arith.constant 0 : index
    %c0_2 = arith.constant 0 : index
    %1 = vector.load %arg1[%c0_1, %c0_2] : memref<42x128xf32, #tpu.memory_space<vmem>>, vector<42x128xf32>
    %cst = arith.constant dense<0.000000e+00> : vector<60x128xf32>
    %2 = tpu.matmul %0, %1, %cst {dimension_numbers = #tpu.dot_dimension_numbers<[1], [0], [0], [1], [0, 0, 1, 1], [], []>} : vector<60x42xf32>, vector<42x128xf32>, vector<60x128xf32> -> vector<60x128xf32>
    %c0_3 = arith.constant 0 : index
    %c0_4 = arith.constant 0 : index
    %3 = vector.load %arg3[%c0_3, %c0_4] : memref<60x1xf32, #tpu.memory_space<vmem>>, vector<60x1xf32>
    %4 = vector.broadcast %3 : vector<60x1xf32> to vector<60x128xf32>
    %5 = arith.addf %2, %4 : vector<60x128xf32>
    %6 = tpu.iota {dimensions = array<i32: 1>} : vector<1x128xi32>
    %c128_i32 = arith.constant 128 : i32
    %7 = arith.muli %arg0, %c128_i32 : i32
    %8 = vector.broadcast %7 : i32 to vector<1x128xi32>
    %9 = arith.addi %6, %8 : vector<1x128xi32>
    %c8_i32 = arith.constant 8 : i32
    %10 = vector.broadcast %c8_i32 : i32 to vector<1x128xi32>
    %11 = arith.cmpi slt, %9, %10 : vector<1x128xi32>
    %cst_5 = arith.constant 0.000000e+00 : f32
    %12 = vector.shape_cast %11 : vector<1x128xi1> to vector<1x128xi1>
    %13 = vector.broadcast %12 : vector<1x128xi1> to vector<60x128xi1>
    %14 = vector.broadcast %cst_5 : f32 to vector<60x128xf32>
    %15 = arith.select %13, %5, %14 : vector<60x128xi1>, vector<60x128xf32>
    %cst_6 = arith.constant 1.000000e+00 : f32
    %16 = vector.broadcast %cst_6 : f32 to vector<128x1xf32>
    %cst_7 = arith.constant dense<0.000000e+00> : vector<60x1xf32>
    %17 = tpu.matmul %15, %16, %cst_7 {dimension_numbers = #tpu.dot_dimension_numbers<[1], [0], [0], [1], [0, 0, 1, 1], [], []>} : vector<60x128xf32>, vector<128x1xf32>, vector<60x1xf32> -> vector<60x1xf32>
    %18 = arith.mulf %15, %15 : vector<60x128xf32>
    %cst_8 = arith.constant dense<0.000000e+00> : vector<60x1xf32>
    %19 = tpu.matmul %18, %16, %cst_8 {dimension_numbers = #tpu.dot_dimension_numbers<[1], [0], [0], [1], [0, 0, 1, 1], [], []>} : vector<60x128xf32>, vector<128x1xf32>, vector<60x1xf32> -> vector<60x1xf32>
    %c0_i32 = arith.constant 0 : i32
    %20 = arith.cmpi eq, %arg0, %c0_i32 : i32
    %21 = arith.extui %20 : i1 to i32
    %c0_i32_9 = arith.constant 0 : i32
    %22 = arith.cmpi ne, %21, %c0_i32_9 : i32
    scf.if %22 {
      %cst_18 = arith.constant 0.000000e+00 : f32
      %29 = vector.broadcast %cst_18 : f32 to vector<60x1xf32>
      %c0_19 = arith.constant 0 : index
      %c0_20 = arith.constant 0 : index
      %30 = vector.load %arg4[%c0_19, %c0_20] : memref<60x1xf32, #tpu.memory_space<vmem>>, vector<60x1xf32>
      tpu.vector_store %arg4[%c0_19, %c0_20], %29 {strides = array<i32>} : memref<60x1xf32, #tpu.memory_space<vmem>>, vector<60x1xf32>,
      %cst_21 = arith.constant 0.000000e+00 : f32
      %31 = vector.broadcast %cst_21 : f32 to vector<60x1xf32>
      %c0_22 = arith.constant 0 : index
      %c0_23 = arith.constant 0 : index
      %32 = vector.load %arg5[%c0_22, %c0_23] : memref<60x1xf32, #tpu.memory_space<vmem>>, vector<60x1xf32>
      tpu.vector_store %arg5[%c0_22, %c0_23], %31 {strides = array<i32>} : memref<60x1xf32, #tpu.memory_space<vmem>>, vector<60x1xf32>,
    } else {
    }
    %c0_10 = arith.constant 0 : index
    %c0_11 = arith.constant 0 : index
    %23 = vector.load %arg4[%c0_10, %c0_11] : memref<60x1xf32, #tpu.memory_space<vmem>>, vector<60x1xf32>
    %24 = arith.addf %23, %17 : vector<60x1xf32>
    %c0_12 = arith.constant 0 : index
    %c0_13 = arith.constant 0 : index
    %25 = vector.load %arg4[%c0_12, %c0_13] : memref<60x1xf32, #tpu.memory_space<vmem>>, vector<60x1xf32>
    tpu.vector_store %arg4[%c0_12, %c0_13], %24 {strides = array<i32>} : memref<60x1xf32, #tpu.memory_space<vmem>>, vector<60x1xf32>,
    %c0_14 = arith.constant 0 : index
    %c0_15 = arith.constant 0 : index
    %26 = vector.load %arg5[%c0_14, %c0_15] : memref<60x1xf32, #tpu.memory_space<vmem>>, vector<60x1xf32>
    %27 = arith.addf %26, %19 : vector<60x1xf32>
    %c0_16 = arith.constant 0 : index
    %c0_17 = arith.constant 0 : index
    %28 = vector.load %arg5[%c0_16, %c0_17] : memref<60x1xf32, #tpu.memory_space<vmem>>, vector<60x1xf32>
    tpu.vector_store %arg5[%c0_16, %c0_17], %27 {strides = array<i32>} : memref<60x1xf32, #tpu.memory_space<vmem>>, vector<60x1xf32>,
    return
  }
  func.func @transform_0(%arg0: i32) -> (i32, i32) {
    %c0_i32 = arith.constant 0 : i32
    %c0_i32_0 = arith.constant 0 : i32
    return %c0_i32, %arg0 : i32, i32
  }
  func.func @transform_1(%arg0: i32) -> (i32, i32) {
    %c0_i32 = arith.constant 0 : i32
    %c0_i32_0 = arith.constant 0 : i32
    %c0_i32_1 = arith.constant 0 : i32
    return %c0_i32, %c0_i32_0 : i32, i32
  }
  func.func @transform_2(%arg0: i32) -> (i32, i32) {
    %c0_i32 = arith.constant 0 : i32
    %c0_i32_0 = arith.constant 0 : i32
    %c0_i32_1 = arith.constant 0 : i32
    return %c0_i32, %c0_i32_0 : i32, i32
  }
  func.func @transform_3(%arg0: i32) -> (i32, i32) {
    %c0_i32 = arith.constant 0 : i32
    %c0_i32_0 = arith.constant 0 : i32
    %c0_i32_1 = arith.constant 0 : i32
    return %c0_i32, %c0_i32_0 : i32, i32
  }
  func.func @transform_4(%arg0: i32) -> (i32, i32) {
    %c0_i32 = arith.constant 0 : i32
    %c0_i32_0 = arith.constant 0 : i32
    %c0_i32_1 = arith.constant 0 : i32
    return %c0_i32, %c0_i32_0 : i32, i32
  }
}

</mosaic_0001>

<bundles_post_ra>
// kernel: tpu_custom_call.1
= control target key start
LH: loop header
LB: loop body
LE: loop exit
PB: predicated region body
PF: predicated region fallthrough
CT: control target
= control target key end

     0   :  { %vm78_vm0 = vcmask 343040   ;;  %v769_v3 = vmov 0   ;;  %v770_v6 = vmov 1.0|1.0   ;;  %vm103_vm1 = vcmask 1041408   ;;  %s1096_s0 = inlined_call_operand.vmem [shape: f32[42,128], index: 0, kind: input, shape index: {}]   ;;  %s1097_s1 = inlined_call_operand.vmem [shape: f32[60,42], index: 1, kind: input, shape index: {}]   ;;  %s1098_s2 = inlined_call_operand.vmem [shape: f32[60,1], index: 2, kind: input, shape index: {}]   ;;  %s1099_s3 = inlined_call_operand.vmem [shape: f32[60,1], index: 3, kind: output, shape index: {0}]   ;;  %s1100_s4 = inlined_call_operand.vmem [shape: f32[60,1], index: 4, kind: output, shape index: {1}]  }
   0x1   :  { %v24_v0 = vld [vmem:[%s1096_s0] sm:$0xff]  ;;  %v25_v1 = vld [vmem:[%s1096_s0 + $0x8] sm:$0xff]  ;;  %v26_v2 = vld [vmem:[%s1096_s0 + $0x10] sm:$0xff]  ;;  %767 = vset.pattern.permute.xlu0 %v769_v3  ;;  %768 = vset.pattern.permute.xlu1 %v769_v3  ;;  %vm771_vm2 = vmmov 1   ;;  %v212_v27 = vlaneseq  ;;  %vm450_vm5 = vcmask 7168   ;;  %vm458_vm6 = vcmask 3072  }
   0x2   :  { %v717_v4 = vpack.c.bf16 %v25_v1, %v24_v0  ;;  %v27_v5 = vld [vmem:[%s1096_s0 + $0x18] sm:$0xff]  ;;  %731 = vmatprep.subr.bf16.mxu1 %v770_v6  ;;  %v28_v8 = vld [vmem:[%s1096_s0 + $0x20] sm:$0xff]  ;;  %v29_v9 = vld [vmem:[%s1096_s0 + $0x28] sm:$0x3] }
   0x3   :  { %v721_v7 = vpack.c.bf16 %v27_v5, %v26_v2  ;;  %v16_v10 = vld [vmem:[%s1097_s1] sm:$0xff]  ;;  %732 = vmatpush3.bf16.msra.mxu1 %v770_v6  ;;  %v725_v11 = vpack.c.bf16 %v29_v9, %v28_v8  ;;  %v32_v13 = vld [vmem:[%s1098_s2 + $0x10] sm:$0xff]  ;;  %vm726_vm3 = vmpackc.low %vm103_vm1, %vm771_vm2  ;;  %v213_v30 = vand.u32 127, %v212_v27  ;;  %v772_v5 = vmov 0.0  }
   0x4   :  { %718 = vmatprep.subr.bf16.mxu0 %v717_v4  ;;  %617 = vmatprep.mubr.msk.f32.mxu0 %vm78_vm0, %v16_v10  ;;  %v30_v12 = vld [vmem:[%s1098_s2] sm:$0xff]  ;;  %v31_v14 = vld [vmem:[%s1098_s2 + $0x8] sm:$0xff]  ;;  %v33_v15 = vld [vmem:[%s1098_s2 + $0x18] sm:$0xff]  ;;  %452 = vst.msk [vmem:[%s1099_s3 + $0x8] sm:$0xff] %vm450_vm5, %v772_v5 }
   0x5   :  { %720 = vmatpush3.bf16.msra.mxu0 %v717_v4  ;;  %733 = vmatprep.subr.bf16.mxu1 %v770_v6  ;;  %v34_v16 = vld [vmem:[%s1098_s2 + $0x20] sm:$0xff]  ;;  %v35_v17 = vld [vmem:[%s1098_s2 + $0x28] sm:$0xff]  ;;  %v18_v19 = vld [vmem:[%s1097_s1 + $0x10] sm:$0xff]  ;;  %vm217_vm4 = vcmp.lt.s32.totalorder %v213_v30, 8  ;;  %451 = vst.msk [vmem:[%s1099_s3] sm:$0xff] %vm450_vm5, %v772_v5 }
   0x6   :  { %722 = vmatprep.subr.bf16.mxu0 %v721_v7  ;;  %40 = vperm.xlu0 %767, %v30_v12   ;;  %v17_v18 = vld [vmem:[%s1097_s1 + $0x8] sm:$0xff]  ;;  %v36_v20 = vld [vmem:[%s1098_s2 + $0x30] sm:$0xff]  ;;  %v37_v21 = vld [vmem:[%s1098_s2 + $0x38] sm:$0xf]  ;;  %453 = vst.msk [vmem:[%s1099_s3 + $0x10] sm:$0xff] %vm450_vm5, %v772_v5 }
   0x7   :  { %50 = vperm.xlu1 %768, %v32_v13   ;;  %734 = vmatpush3.bf16.msra.mxu1 %v770_v6  ;;  %v19_v22 = vld [vmem:[%s1097_s1 + $0x18] sm:$0xff]  ;;  %v20_v23 = vld [vmem:[%s1097_s1 + $0x20] sm:$0xff]  ;;  %v21_v24 = vld [vmem:[%s1097_s1 + $0x28] sm:$0xff]  ;;  %454 = vst.msk [vmem:[%s1099_s3 + $0x18] sm:$0xff] %vm450_vm5, %v772_v5 }
   0x8   :  { %735 = vmatprep.subr.bf16.mxu1 %v770_v6  ;;  %v22_v25 = vld [vmem:[%s1097_s1 + $0x30] sm:$0xff]  ;;  %v23_v26 = vld [vmem:[%s1097_s1 + $0x38] sm:$0xf]  ;;  %455 = vst.msk [vmem:[%s1099_s3 + $0x20] sm:$0xff] %vm450_vm5, %v772_v5  ;;  %456 = vst.msk [vmem:[%s1099_s3 + $0x28] sm:$0xff] %vm450_vm5, %v772_v5 }
   0x9   :  { %724 = vmatpush3.bf16.msra.mxu0 %v721_v7  ;;  %457 = vst.msk [vmem:[%s1099_s3 + $0x30] sm:$0xff] %vm450_vm5, %v772_v5  ;;  %461 = vst.msk [vmem:[%s1100_s4 + $0x8] sm:$0xff] %vm450_vm5, %v772_v5 }
   0xa   :  { %727 = vmatprep.subr.msk.bf16.mxu0 %vm726_vm3, %v725_v11  ;;  %45 = vperm.xlu0 %767, %v31_v14   ;;  %460 = vst.msk [vmem:[%s1100_s4] sm:$0xff] %vm450_vm5, %v772_v5  ;;  %462 = vst.msk [vmem:[%s1100_s4 + $0x10] sm:$0xff] %vm450_vm5, %v772_v5 }
   0xb   :  { %55 = vperm.xlu1 %768, %v33_v15   ;;  %736 = vmatpush3.bf16.msra.mxu1 %v770_v6  ;;  %463 = vst.msk [vmem:[%s1100_s4 + $0x18] sm:$0xff] %vm450_vm5, %v772_v5  ;;  %464 = vst.msk [vmem:[%s1100_s4 + $0x20] sm:$0xff] %vm450_vm5, %v772_v5 }
   0xc   :  { %737 = vmatprep.subr.bf16.mxu1 %v770_v6  ;;  %465 = vst.msk [vmem:[%s1100_s4 + $0x28] sm:$0xff] %vm450_vm5, %v772_v5  ;;  %466 = vst.msk [vmem:[%s1100_s4 + $0x30] sm:$0xff] %vm450_vm5, %v772_v5  ;;  %v468_v7 = vld [vmem:[%s1099_s3] sm:$0xff] }
   0xd   :  { %730 = vmatpush3.bf16.msk.msra.mxu0 %vm726_vm3, %v725_v11  ;;  %459 = vst.msk [vmem:[%s1099_s3 + $0x38] sm:$0xf] %vm458_vm6, %v772_v5  ;;  %467 = vst.msk [vmem:[%s1100_s4 + $0x38] sm:$0xf] %vm458_vm6, %v772_v5 }
   0xe   :  { %747 = vmatprep.subr.bf16.mxu0 %v770_v6  ;;  %60 = vperm.xlu0 %767, %v34_v16   ;;  %v471_v13 = vld [vmem:[%s1099_s3 + $0x18] sm:$0xff]  ;;  %v470_v16 = vld [vmem:[%s1099_s3 + $0x10] sm:$0xff] }
   0xf   :  { %65 = vperm.xlu1 %768, %v35_v17   ;;  %738 = vmatpush3.bf16.msra.mxu1 %v770_v6 }
  0x10   :  { %618 = vmatmul.mubr.msk.f32.vlgmr.msra.gmra.mrb[0].mxu0 %vm78_vm0, %v17_v18  ;;  %739 = vmatprep.subr.bf16.mxu1 %v770_v6  ;;  %v495_v11 = vld [vmem:[%s1100_s4 + $0x8] sm:$0xff] }
  0x11   :  { %620 = vmatprep.mubr.msk.f32.mxu0 %vm78_vm0, %v18_v19  ;;  %748 = vmatpush3.bf16.msra.mxu0 %v770_v6  ;;  %v494_v14 = vld [vmem:[%s1100_s4] sm:$0xff] }
  0x12   :  { %749 = vmatprep.subr.bf16.mxu0 %v770_v6  ;;  %70 = vperm.xlu0 %767, %v36_v20  }
  0x13   :  { %75 = vperm.xlu1 %768, %v37_v21   ;;  %740 = vmatpush3.bf16.msra.mxu1 %v770_v6 }
  0x14   :  { %621 = vmatmul.mubr.msk.f32.gmra.mrb[2].mxu0 %vm78_vm0, %v19_v22  ;;  %741 = vmatprep.subr.bf16.mxu1 %v770_v6 }
  0x15   :  { %623 = vmatprep.mubr.msk.f32.mxu0 %vm78_vm0, %v20_v23  ;;  %750 = vmatpush3.bf16.msra.mxu0 %v770_v6  ;;  %v497_v23 = vld [vmem:[%s1100_s4 + $0x18] sm:$0xff] }
  0x16   :  { %751 = vmatprep.subr.bf16.mxu0 %v770_v6 }
  0x17   :  { %742 = vmatpush3.bf16.msra.mxu1 %v770_v6 }
  0x18   :  { %624 = vmatmul.mubr.msk.f32.gmra.mrb[4].mxu0 %vm78_vm0, %v21_v24  ;;  %743 = vmatprep.subr.bf16.mxu1 %v770_v6 }
  0x19   :  { %626 = vmatprep.mubr.msk.f32.mxu0 %vm78_vm0, %v22_v25  ;;  %752 = vmatpush3.bf16.msra.mxu0 %v770_v6  ;;  %v473_v25 = vld [vmem:[%s1099_s3 + $0x28] sm:$0xff] }
  0x1a   :  { %753 = vmatprep.subr.bf16.mxu0 %v770_v6 }
  0x1b   :  { %744 = vmatpush3.bf16.msra.mxu1 %v770_v6 }
  0x1c   :  { %627 = vmatmul.mubr.msk.f32.gmra.mrb[6].mxu0 %vm78_vm0, %v23_v26  ;;  %745 = vmatprep.subr.bf16.mxu1 %v770_v6  ;;  %v496_v26 = vld [vmem:[%s1100_s4 + $0x10] sm:$0xff] }
  0x1d   :  { %754 = vmatpush3.bf16.msra.mxu0 %v770_v6 }
  0x1e   :  { %755 = vmatprep.subr.bf16.mxu0 %v770_v6 }
  0x1f   :  { %746 = vmatpush3.bf16.msra.mxu1 %v770_v6 }
  0x21   :  { %756 = vmatpush3.bf16.msra.mxu0 %v770_v6 }
  0x22   :  { %757 = vmatprep.subr.bf16.mxu0 %v770_v6 }
  0x25   :  { %758 = vmatpush3.bf16.msra.mxu0 %v770_v6 }
  0x26   :  { %759 = vmatprep.subr.bf16.mxu0 %v770_v6 }
  0x29   :  { %760 = vmatpush3.bf16.msra.mxu0 %v770_v6 }
  0x2a   :  { %761 = vmatprep.subr.bf16.mxu0 %v770_v6 }
  0x2d   :  { %762 = vmatpush3.bf16.msra.mxu0 %v770_v6  ;;  %v469_v6 = vld [vmem:[%s1099_s3 + $0x8] sm:$0xff] }
  0x85   :  { %v41_v28 = vpop.permute.xlu0 %40 }
  0x86   :  { %v51_v29 = vpop.permute.xlu1 %50 }
  0x89   :  { %v46_v31 = vpop.permute.xlu0 %45 }
  0x8a   :  { %v56_v32 = vpop.permute.xlu1 %55 }
  0x8d   :  { %v61_v46 = vpop.permute.xlu0 %60 }
  0x8e   :  { %v66_v43 = vpop.permute.xlu1 %65 }
  0x91   :  { %v71_v59 = vpop.permute.xlu0 %70 }
  0x92   :  { %v76_v56 = vpop.permute.xlu1 %75 }
  0xe3   :  { %v619_v33 = vpop.f32.mrb[0].mxu0 }
  0xe4   :  { %v179_v34 = vadd.f32 %v619_v33, %v46_v31  ;;  %v173_v35 = vpop.f32.mrb[1].mxu0 }
  0xe5   :  { %v174_v36 = vadd.f32 %v173_v35, %v41_v28  ;;  %v472_v28 = vld [vmem:[%s1099_s3 + $0x20] sm:$0xff]  ;;  %v499_v35 = vld [vmem:[%s1100_s4 + $0x28] sm:$0xff] }
  0xe6   :  { %v221_v37 = vsel %vm217_vm4, %v179_v34, 0.0 }
  0xe7   :  { %v220_v38 = vsel %vm217_vm4, %v174_v36, 0.0  ;;  %v622_v39 = vpop.f32.mrb[2].mxu0  ;;  %661 = vmatprep.mubr.msk.f32.mxu1 %vm217_vm4, %v174_v36  ;;  %v334_v44 = vmul.f32 %v221_v37, %v221_v37  ;;  %v475_v37 = vld [vmem:[%s1099_s3 + $0x38] sm:$0xf] }
  0xe8   :  { %v333_v40 = vmul.f32 %v220_v38, %v220_v38  ;;  %v189_v41 = vadd.f32 %v622_v39, %v56_v32  ;;  %v183_v42 = vpop.f32.mrb[3].mxu0  ;;  %662 = vmatmul.mubr.msk.f32.vlgmr.msra.gmra.mrb[0].mxu1 %vm217_vm4, %v179_v34  ;;  %v498_v38 = vld [vmem:[%s1100_s4 + $0x20] sm:$0xff] }
  0xe9   :  { %v184_v45 = vadd.f32 %v183_v42, %v51_v29 }
  0xea   :  { %v223_v47 = vsel %vm217_vm4, %v189_v41, 0.0  ;;  %705 = vmatprep.mubr.f32.mxu0 %v333_v40  ;;  %v474_v40 = vld [vmem:[%s1099_s3 + $0x30] sm:$0xff] }
  0xeb   :  { %v222_v48 = vsel %vm217_vm4, %v184_v45, 0.0  ;;  %v625_v49 = vpop.f32.mrb[4].mxu0  ;;  %664 = vmatprep.mubr.msk.f32.mxu1 %vm217_vm4, %v184_v45  ;;  %706 = vmatmul.mubr.f32.vlgmr.msra.gmra.mrb[8].mxu0 %v334_v44  ;;  %v336_v53 = vmul.f32 %v223_v47, %v223_v47  ;;  %v501_v47 = vld [vmem:[%s1100_s4 + $0x38] sm:$0xf] }
  0xec   :  { %v335_v50 = vmul.f32 %v222_v48, %v222_v48  ;;  %v199_v51 = vadd.f32 %v625_v49, %v66_v43  ;;  %v193_v52 = vpop.f32.mrb[5].mxu0  ;;  %665 = vmatmul.mubr.msk.f32.gmra.mrb[2].mxu1 %vm217_vm4, %v189_v41  ;;  %v500_v49 = vld [vmem:[%s1100_s4 + $0x30] sm:$0xff] }
  0xed   :  { %v194_v54 = vadd.f32 %v193_v52, %v61_v46 }
  0xee   :  { %v225_v55 = vsel %vm217_vm4, %v199_v51, 0.0  ;;  %708 = vmatprep.mubr.f32.mxu0 %v335_v50 }
  0xef   :  { %v224_v57 = vsel %vm217_vm4, %v194_v54, 0.0  ;;  %v628_v58 = vpop.f32.mrb[6].mxu0  ;;  %667 = vmatprep.mubr.msk.f32.mxu1 %vm217_vm4, %v194_v54  ;;  %709 = vmatmul.mubr.f32.gmra.mrb[10].mxu0 %v336_v53  ;;  %v338_v63 = vmul.f32 %v225_v55, %v225_v55 }
  0xf0   :  { %v337_v60 = vmul.f32 %v224_v57, %v224_v57  ;;  %v209_v61 = vadd.f32 %v628_v58, %v76_v56  ;;  %v203_v62 = vpop.f32.mrb[7].mxu0  ;;  %668 = vmatmul.mubr.msk.f32.gmra.mrb[4].mxu1 %vm217_vm4, %v199_v51 }
  0xf1   :  { %v204_v0 = vadd.f32 %v203_v62, %v71_v59 }
  0xf2   :  { %v227_v1 = vsel %vm217_vm4, %v209_v61, 0.0  ;;  %711 = vmatprep.mubr.f32.mxu0 %v337_v60 }
  0xf3   :  { %v226_v2 = vsel %vm217_vm4, %v204_v0, 0.0  ;;  %670 = vmatprep.mubr.msk.f32.mxu1 %vm217_vm4, %v204_v0  ;;  %712 = vmatmul.mubr.f32.gmra.mrb[12].mxu0 %v338_v63  ;;  %v340_v4 = vmul.f32 %v227_v1, %v227_v1 }
  0xf4   :  { %v339_v3 = vmul.f32 %v226_v2, %v226_v2  ;;  %671 = vmatmul.mubr.msk.f32.gmra.mrb[6].mxu1 %vm217_vm4, %v209_v61 }
  0xf6   :  { %714 = vmatprep.mubr.f32.mxu0 %v339_v3 }
  0xf7   :  { %715 = vmatmul.mubr.f32.gmra.mrb[14].mxu0 %v340_v4 }
 0x1bb   :  { %v663_v8 = vpop.f32.mrb[0].mxu1 }
 0x1bc   :  { %v477_v9 = vadd.f32 %v663_v8, %v469_v6  ;;  %v294_v10 = vpop.f32.mrb[1].mxu1 }
 0x1bd   :  { %v476_v12 = vadd.f32 %v468_v7, %v294_v10 }
 0x1be   :  { %486 = vst.msk [vmem:[%s1099_s3 + $0x8] sm:$0xff] %vm450_vm5, %v477_v9  ;;  %v707_v15 = vpop.f32.mrb[8].mxu0 }
 0x1bf   :  { %485 = vst.msk [vmem:[%s1099_s3] sm:$0xff] %vm450_vm5, %v476_v12  ;;  %v503_v17 = vadd.f32 %v707_v15, %v495_v11  ;;  %v666_v18 = vpop.f32.mrb[2].mxu1  ;;  %v407_v19 = vpop.f32.mrb[9].mxu0 }
 0x1c0   :  { %v479_v20 = vadd.f32 %v666_v18, %v471_v13  ;;  %v502_v21 = vadd.f32 %v494_v14, %v407_v19  ;;  %v304_v22 = vpop.f32.mrb[3].mxu1 }
 0x1c1   :  { %511 = vst.msk [vmem:[%s1100_s4 + $0x8] sm:$0xff] %vm450_vm5, %v503_v17  ;;  %v478_v24 = vadd.f32 %v470_v16, %v304_v22 }
 0x1c2   :  { %488 = vst.msk [vmem:[%s1099_s3 + $0x18] sm:$0xff] %vm450_vm5, %v479_v20  ;;  %510 = vst.msk [vmem:[%s1100_s4] sm:$0xff] %vm450_vm5, %v502_v21  ;;  %v710_v27 = vpop.f32.mrb[10].mxu0 }
 0x1c3   :  { %487 = vst.msk [vmem:[%s1099_s3 + $0x10] sm:$0xff] %vm450_vm5, %v478_v24  ;;  %v505_v29 = vadd.f32 %v710_v27, %v497_v23  ;;  %v669_v30 = vpop.f32.mrb[4].mxu1  ;;  %v417_v31 = vpop.f32.mrb[11].mxu0 }
 0x1c4   :  { %v481_v32 = vadd.f32 %v669_v30, %v473_v25  ;;  %v504_v33 = vadd.f32 %v496_v26, %v417_v31  ;;  %v314_v34 = vpop.f32.mrb[5].mxu1 }
 0x1c5   :  { %513 = vst.msk [vmem:[%s1100_s4 + $0x18] sm:$0xff] %vm450_vm5, %v505_v29  ;;  %v480_v36 = vadd.f32 %v472_v28, %v314_v34 }
 0x1c6   :  { %490 = vst.msk [vmem:[%s1099_s3 + $0x28] sm:$0xff] %vm450_vm5, %v481_v32  ;;  %512 = vst.msk [vmem:[%s1100_s4 + $0x10] sm:$0xff] %vm450_vm5, %v504_v33  ;;  %v713_v39 = vpop.f32.mrb[12].mxu0 }
 0x1c7   :  { %489 = vst.msk [vmem:[%s1099_s3 + $0x20] sm:$0xff] %vm450_vm5, %v480_v36  ;;  %v507_v41 = vadd.f32 %v713_v39, %v499_v35  ;;  %v672_v42 = vpop.f32.mrb[6].mxu1  ;;  %v427_v43 = vpop.f32.mrb[13].mxu0 }
 0x1c8   :  { %v483_v44 = vadd.f32 %v672_v42, %v475_v37  ;;  %v506_v45 = vadd.f32 %v498_v38, %v427_v43  ;;  %v324_v46 = vpop.f32.mrb[7].mxu1 }
 0x1c9   :  { %515 = vst.msk [vmem:[%s1100_s4 + $0x28] sm:$0xff] %vm450_vm5, %v507_v41  ;;  %v482_v48 = vadd.f32 %v474_v40, %v324_v46 }
 0x1ca   :  { %493 = vst.msk [vmem:[%s1099_s3 + $0x38] sm:$0xf] %vm458_vm6, %v483_v44  ;;  %v716_v50 = vpop.f32.mrb[14].mxu0 }
 0x1cb   :  { %514 = vst.msk [vmem:[%s1100_s4 + $0x20] sm:$0xff] %vm450_vm5, %v506_v45  ;;  %491 = vst.msk [vmem:[%s1099_s3 + $0x30] sm:$0xff] %vm450_vm5, %v482_v48  ;;  %v509_v51 = vadd.f32 %v716_v50, %v501_v47  ;;  %v437_v52 = vpop.f32.mrb[15].mxu0 }
 0x1cc   :  { %v508_v53 = vadd.f32 %v500_v49, %v437_v52 }
 0x1cd   :  { %517 = vst.msk [vmem:[%s1100_s4 + $0x38] sm:$0xf] %vm458_vm6, %v509_v51 }
 0x1ce   :  { %516 = vst.msk [vmem:[%s1100_s4 + $0x30] sm:$0xff] %vm450_vm5, %v508_v53 }

</bundles_post_ra>
